<compile_context>
chip_gen: v5e
topology: v5e:2x2
jax: 0.10.0
libtpu: 0.0.40
codegen_flags: <defaults>
</compile_context>

<pallas_src>
import functools

import jax
import jax.numpy as jnp
from jax.experimental import pallas as pl
from jax.experimental.pallas import tpu as pltpu

_LANES = 128


def _round_up(x, m):
    return ((x + m - 1) // m) * m


def _vmem_limit_bytes():
    """Scoped-VMEM request that is safe per TensorCore on every generation."""
    try:
        cap = int(pltpu.get_tpu_info().vmem_capacity_bytes)
    except Exception:
        cap = 64 * 1024 * 1024
    # The query may report chip-level capacity (128 MiB) on a 64 MiB/TC part
    # (v7x), so clamp to a conservative per-TC budget with compiler headroom.
    return min((cap * 3) // 4, 48 * 1024 * 1024)


def _gap_kernel(x_ref, o_ref, acc_ref, *, s_total, s_tile, n_chunks,
                full_chunks, inv_s):
    """One (tile_rows, s_tile) block; accumulate over the S grid axis."""
    tile_rows = acc_ref.shape[0]
    k = pl.program_id(1)

    @pl.when(k == 0)
    def _init():
        acc_ref[...] = jnp.zeros_like(acc_ref)

    # Lane index, hoisted; only needed if some chunk can cross the S bound.
    if full_chunks < n_chunks:
        lane = jax.lax.broadcasted_iota(jnp.int32, (tile_rows, _LANES), 1)
    base = k * s_tile

    def leaf(c):
        # 128-lane aligned chunk; per-chunk f32 widen so narrow dtypes stream
        # through HBM/VMEM un-widened.
        v = x_ref[:, c * _LANES:(c + 1) * _LANES].astype(jnp.float32)
        if c >= full_chunks:
            # This chunk may straddle / exceed the true S extent on the last
            # S-block (edge-block data past the array bound is unspecified).
            v = jnp.where(lane < (s_total - (base + c * _LANES)), v, 0.0)
        return v

    def tree(lo, hi):
        # Balanced pairwise combine: short dependency chain, pure VPU adds.
        if hi - lo == 1:
            return leaf(lo)
        mid = (lo + hi) // 2
        return tree(lo, mid) + tree(mid, hi)

    acc_ref[...] += tree(0, n_chunks)

    @pl.when(k == pl.num_programs(1) - 1)
    def _finalize():
        total = jnp.sum(acc_ref[...], axis=-1)   # single XLU reduce per tile
        o_ref[...] = (total * inv_s).astype(o_ref.dtype).reshape(1, -1)


def global_avg_pool3d(x, *, min_pallas_bytes=1 << 20, block_target_bytes=8 << 20):
    """Equivalent of F.avg_pool3d(x, kernel_size=x.size()[2:]) for NCDHW x."""
    N, C, D, H, W = x.shape
    S = D * H * W
    rows = N * C
    itemsize = jnp.dtype(x.dtype).itemsize

    # Tiny inputs: launch + per-step overhead dominates; let XLA fuse it.
    if rows * S * itemsize < min_pallas_bytes:
        return jnp.mean(x, axis=(2, 3, 4), keepdims=True,
                        dtype=jnp.float32).astype(x.dtype)

    sublane_pack = {4: 8, 2: 16, 1: 32}.get(itemsize, 8)

    # ---- row tiling (no budget-maxing; keep vreg/VMEM pressure low) --------
    rows_sub = _round_up(rows, sublane_pack)
    if rows_sub > 512:
        tile_rows = 256            # multiple of 128 -> lane-dense output blocks
    elif rows_sub >= 256:
        tile_rows = 128            # >=2 row tiles so both v7x TensorCores run
    else:
        tile_rows = rows_sub       # single row tile: out block == full out row
    n_row_tiles = pl.cdiv(rows, tile_rows)
    rows_out = n_row_tiles * tile_rows
    # TODO(synk): for rows too small to split while S is huge, a 2-way
    # core-parallel split of the S range (partial sums + tiny epilogue) would
    # engage the second v7x TensorCore; not implemented here.

    # ---- reduction-axis tiling: minimal padding, ~block_target blocks ------
    s_max = (block_target_bytes // (tile_rows * itemsize)) // _LANES * _LANES
    s_max = max(512, min(32768, s_max))
    n_k_target = pl.cdiv(S, s_max)
    s_tile = _round_up(pl.cdiv(S, n_k_target), _LANES)
    n_k = pl.cdiv(S, s_tile)
    n_chunks = s_tile // _LANES
    valid_last = S - (n_k - 1) * s_tile      # valid lanes in the last S-block
    full_chunks = valid_last // _LANES       # chunks never needing a mask

    x2 = x.reshape(rows, S)                  # pure view change, no HBM copy

    kernel = functools.partial(
        _gap_kernel, s_total=S, s_tile=s_tile, n_chunks=n_chunks,
        full_chunks=full_chunks, inv_s=float(1.0 / S))

    out = pl.pallas_call(
        kernel,
        out_shape=jax.ShapeDtypeStruct((1, rows_out), x.dtype),
        grid_spec=pltpu.PrefetchScalarGridSpec(
            num_scalar_prefetch=0,
            grid=(n_row_tiles, n_k),
            in_specs=[pl.BlockSpec((tile_rows, s_tile), lambda i, k: (i, k))],
            out_specs=pl.BlockSpec((1, tile_rows), lambda i, k: (0, i)),
            scratch_shapes=[pltpu.VMEM((tile_rows, _LANES), jnp.float32)],
        ),
        compiler_params=pltpu.CompilerParams(
            dimension_semantics=("parallel", "arbitrary"),
            vmem_limit_bytes=int(_vmem_limit_bytes()),
        ),
        cost_estimate=pl.CostEstimate(
            flops=rows * S,
            transcendentals=0,
            bytes_accessed=rows * S * itemsize + rows_out * itemsize,
        ),
    )(x2)

    return out.reshape(-1)[:rows].reshape(N, C, 1, 1, 1)


def _ref(x):
    return jnp.mean(x.astype(jnp.float32), axis=(2, 3, 4),
                    keepdims=True).astype(x.dtype)


if __name__ == "__main__":
    key = jax.random.PRNGKey(0)
    keys = jax.random.split(key, 4)

    # 1) Small NCDHW input consistent with the module (batch=2, channels=4,
    #    D=H=W=4).  S=64 < 128 exercises the lane-masked single-chunk path.
    x1 = jax.random.normal(keys[0], (2, 4, 4, 4, 4), dtype=jnp.float32)
    y1 = global_avg_pool3d(x1, min_pallas_bytes=0)
    jax.block_until_ready(y1)
    assert y1.shape == (2, 4, 1, 1, 1), y1.shape
    assert jnp.allclose(y1, _ref(x1), atol=1e-5, rtol=1e-5), "mismatch (case 1)"

    # 2) Ragged S (16*15*14 = 3360): single S-block with a masked tail chunk.
    x2 = jax.random.normal(keys[1], (2, 4, 16, 15, 14), dtype=jnp.float32)
    y2 = global_avg_pool3d(x2, min_pallas_bytes=0)
    jax.block_until_ready(y2)
    assert y2.shape == (2, 4, 1, 1, 1), y2.shape
    assert jnp.allclose(y2, _ref(x2), atol=1e-5, rtol=1e-5), "mismatch (case 2)"

    # 3) Force the multi-step S accumulator path (tiny block budget -> n_k=2)
    #    with a ragged, masked final S block.
    x3 = jax.random.normal(keys[2], (2, 4, 8, 8, 9), dtype=jnp.float32)
    y3 = global_avg_pool3d(x3, min_pallas_bytes=0, block_target_bytes=16384)
    jax.block_until_ready(y3)
    assert y3.shape == (2, 4, 1, 1, 1), y3.shape
    assert jnp.allclose(y3, _ref(x3), atol=1e-5, rtol=1e-5), "mismatch (case 3)"

    # 4) Many channels -> multiple (128-row) row tiles with a ragged last row
    #    tile; exercises lane-dense output blocks and the final slice.
    x4 = jax.random.normal(keys[3], (2, 130, 4, 4, 4), dtype=jnp.float32)
    y4 = global_avg_pool3d(x4, min_pallas_bytes=0)
    jax.block_until_ready(y4)
    assert y4.shape == (2, 130, 1, 1, 1), y4.shape
    assert jnp.allclose(y4, _ref(x4), atol=1e-5, rtol=1e-5), "mismatch (case 4)"

    # 5) bf16 input: per-chunk f32 widen + padded sublane-pack row tile.
    x5 = jax.random.normal(keys[0], (2, 4, 4, 4, 4), dtype=jnp.bfloat16)
    y5 = global_avg_pool3d(x5, min_pallas_bytes=0)
    jax.block_until_ready(y5)
    assert y5.shape == (2, 4, 1, 1, 1), y5.shape
    assert jnp.allclose(y5.astype(jnp.float32), _ref(x5).astype(jnp.float32),
                        atol=2e-2, rtol=2e-2), "mismatch (case 5, bf16)"

    print("KERNEL_OK")
</pallas_src>

<mosaic_0001>
module attributes {stable_mosaic.version = 11 : i64} {
  func.func @_gap_kernel(%arg0: i32, %arg1: i32, %arg2: memref<8x128xf32, #tpu.memory_space<vmem>>, %arg3: memref<1x8xf32, #tpu.memory_space<vmem>>, %arg4: memref<8x128xf32, #tpu.memory_space<vmem>>) attributes {dimension_semantics = [#tpu.dimension_semantics<parallel>, #tpu.dimension_semantics<arbitrary>], iteration_bounds = array<i64: 1, 1>, scalar_prefetch = 0 : i64, scratch_operands = 1 : i64, tpu.core_type = #tpu.core_type<tc>, window_params = [{transform_indices = @transform_0, window_bounds = array<i64: 8, 128>}, {transform_indices = @transform_1, window_bounds = array<i64: 1, 8>}]} {
    %c0_i32 = arith.constant 0 : i32
    %0 = arith.cmpi eq, %arg1, %c0_i32 : i32
    %1 = arith.extui %0 : i1 to i32
    %c0_i32_0 = arith.constant 0 : i32
    %2 = arith.cmpi ne, %1, %c0_i32_0 : i32
    scf.if %2 {
      %cst_9 = arith.constant 0.000000e+00 : f32
      %18 = vector.broadcast %cst_9 : f32 to vector<8x128xf32>
      %c0_10 = arith.constant 0 : index
      %c0_11 = arith.constant 0 : index
      %19 = vector.load %arg4[%c0_10, %c0_11] : memref<8x128xf32, #tpu.memory_space<vmem>>, vector<8x128xf32>
      tpu.vector_store %arg4[%c0_10, %c0_11], %18 {strides = array<i32>} : memref<8x128xf32, #tpu.memory_space<vmem>>, vector<8x128xf32>,
    } else {
    }
    %3 = tpu.iota {dimensions = array<i32: 1>} : vector<8x128xi32>
    %c128_i32 = arith.constant 128 : i32
    %4 = arith.muli %arg1, %c128_i32 : i32
    %c0 = arith.constant 0 : index
    %c0_1 = arith.constant 0 : index
    %5 = vector.load %arg4[%c0, %c0_1] : memref<8x128xf32, #tpu.memory_space<vmem>>, vector<8x128xf32>
    %c0_2 = arith.constant 0 : index
    %c0_3 = arith.constant 0 : index
    %6 = vector.load %arg2[%c0_2, %c0_3] : memref<8x128xf32, #tpu.memory_space<vmem>>, vector<8x128xf32>
    %c0_i32_4 = arith.constant 0 : i32
    %7 = arith.addi %4, %c0_i32_4 : i32
    %c64_i32 = arith.constant 64 : i32
    %8 = arith.subi %c64_i32, %7 : i32
    %9 = vector.broadcast %8 : i32 to vector<8x128xi32>
    %10 = arith.cmpi slt, %3, %9 : vector<8x128xi32>
    %cst = arith.constant 0.000000e+00 : f32
    %11 = vector.broadcast %cst : f32 to vector<8x128xf32>
    %12 = arith.select %10, %6, %11 : vector<8x128xi1>, vector<8x128xf32>
    %13 = arith.addf %5, %12 : vector<8x128xf32>
    %c0_5 = arith.constant 0 : index
    %c0_6 = arith.constant 0 : index
    %14 = vector.load %arg4[%c0_5, %c0_6] : memref<8x128xf32, #tpu.memory_space<vmem>>, vector<8x128xf32>
    tpu.vector_store %arg4[%c0_5, %c0_6], %13 {strides = array<i32>} : memref<8x128xf32, #tpu.memory_space<vmem>>, vector<8x128xf32>,
    %c0_i32_7 = arith.constant 0 : i32
    %15 = arith.cmpi eq, %arg1, %c0_i32_7 : i32
    %16 = arith.extui %15 : i1 to i32
    %c0_i32_8 = arith.constant 0 : i32
    %17 = arith.cmpi ne, %16, %c0_i32_8 : i32
    scf.if %17 {
      %c0_9 = arith.constant 0 : index
      %c0_10 = arith.constant 0 : index
      %18 = vector.load %arg4[%c0_9, %c0_10] : memref<8x128xf32, #tpu.memory_space<vmem>>, vector<8x128xf32>
      %cst_11 = arith.constant dense<0.000000e+00> : vector<8xf32>
      %19 = vector.multi_reduction <add>, %18, %cst_11 [1] : vector<8x128xf32> to vector<8xf32>
      %cst_12 = arith.constant 1.562500e-02 : f32
      %20 = vector.broadcast %cst_12 : f32 to vector<8xf32>
      %21 = arith.mulf %19, %20 : vector<8xf32>
      %22 = vector.shape_cast %21 : vector<8xf32> to vector<1x8xf32>
      %c0_13 = arith.constant 0 : index
      %c0_14 = arith.constant 0 : index
      %23 = vector.load %arg3[%c0_13, %c0_14] : memref<1x8xf32, #tpu.memory_space<vmem>>, vector<1x8xf32>
      tpu.vector_store %arg3[%c0_13, %c0_14], %22 {strides = array<i32>} : memref<1x8xf32, #tpu.memory_space<vmem>>, vector<1x8xf32>,
    } else {
    }
    return
  }
  func.func @transform_0(%arg0: i32, %arg1: i32) -> (i32, i32) {
    %c0_i32 = arith.constant 0 : i32
    return %arg0, %arg1 : i32, i32
  }
  func.func @transform_1(%arg0: i32, %arg1: i32) -> (i32, i32) {
    %c0_i32 = arith.constant 0 : i32
    %c0_i32_0 = arith.constant 0 : i32
    return %c0_i32, %arg0 : i32, i32
  }
}

</mosaic_0001>

<bundles_post_ra>
// kernel: tpu_custom_call.1
= control target key start
LH: loop header
LB: loop body
LE: loop exit
PB: predicated region body
PF: predicated region fallthrough
CT: control target
= control target key end

     0   :  { %6 = vsyncpa [#allocation4], 0  ;;  %s140_s0 = inlined_call_operand.hbm [shape: f32[8,64], index: 0, kind: input, shape index: {}]   ;;  %s141_s1 = inlined_call_operand.hbm [shape: f32[1,8], index: 1, kind: output, shape index: {}]  }
   0x1   :  { %7 = vsyncpa [#allocation5], 0  ;;  %s13_s8 = sshll.u32 %s140_s0, 4  ;;  %s122_s9 = smov [#allocation3]   ;;  %s14_s8 = int_to_ptr.hbm [resolvable:$true] %s13_s8 }
   0x2   :  { %s15_s10 = sshll.u32 %s122_s9, 4  ;;  %s16_s10 = int_to_ptr.vmem [resolvable:$true] %s15_s10 }
   0x3   :  { %18 = dma.hbm_to_vmem [thread:$0]  %s14_s8, 128, %s16_s10, [#allocation4]  }
   0x4   :  { %118 = dma.done.wait [#allocation4], 128  }
   0x5   :  { %119 = vsyncadd [#allocation4], 4294967168  ;;  %v28_v0 = vlaneseq  ;;  %v32_v2 = vld [vmem:[#allocation3] sm:$0xff]  ;;  %s123_s11 = smov [#allocation6]   ;;  %s58_s0 = sshll.u32 %s141_s1, 4  ;;  %vm49_vm1 = vcmask 57344   ;;  %s59_s0 = int_to_ptr.hbm [resolvable:$true] %s58_s0 }
   0x6   :  { %s56_s12 = sshll.u32 %s123_s11, 4  ;;  %s57_s12 = int_to_ptr.vmem [resolvable:$true] %s56_s12 }
   0x7   :  { %v29_v1 = vand.u32 127, %v28_v0 }
   0x9   :  { %vm35_vm0 = vcmp.lt.s32.totalorder %v29_v1, 64 }
   0xa   :  { %v36_v3 = vsel %vm35_vm0, %v32_v2, 0.0 }
   0xb   :  { %43 = vadd.xlane.f32.xlu0 %v36_v3 }
  0x7e   :  { %v44_v4 = vpop.xlane.xlu0 %43 }
  0x7f   :  { %v45_v5 = vmul.f32 0.015625, %v44_v4 }
  0x81   :  { %v47_v6 = vperm.slane %v45_v5, %v29_v1 }
  0x83   :  { %50 = vst.msk [vmem:[#allocation6] sm:$0x1] %vm49_vm1, %v47_v6 }
  0x84   :  { %61 = dma.vmem_to_hbm [thread:$0]  %s57_s12, 16, %s59_s0, [#allocation5]  }
  0x85   :  { %120 = dma.done.wait [#allocation5], 16  }
  0x86   :  { %121 = vsyncadd [#allocation5], 4294967280 }
  0x87   :  { %66 = vsyncpa [#allocation4], 1 }
  0x88   :  { %67 = vsyncpa [#allocation5], 1 }

</bundles_post_ra>
